<compile_context>
chip_gen: v7x
topology: tpu7x:2x2x1
jax: 0.10.0
libtpu: 0.0.40
codegen_flags: <defaults>
</compile_context>

<pallas_src>
import jax
import jax.numpy as jnp
from jax.experimental import pallas as pl
from jax.experimental.pallas import tpu as pltpu


def classifier_kernel(x_ref, w1t_ref, pool_ref, lwt_ref, o_ref):
    # (R, D1) @ (D1, E) -> (R, E), ReLU.  bf16 operands, f32 MXU accumulation.
    lf = jnp.maximum(
        jnp.dot(x_ref[...], w1t_ref[...], preferred_element_type=jnp.float32),
        0.0,
    ).astype(jnp.bfloat16)                                            # (R, E)

    # Per-group mean via a block-diagonal 0/1 pooling matmul on the MXU
    # (valid for arbitrary J; the 1/J scale is folded into lwt_ref).
    pooled = jnp.dot(
        pool_ref[...], lf, preferred_element_type=jnp.float32
    ).astype(jnp.bfloat16)                                            # (TB, E)

    # cat((p, p), 1) @ Lw.T / J  ==  p @ ((Lw[:, :E] + Lw[:, E:]).T / J)
    o_ref[...] = jnp.dot(
        pooled, lwt_ref[...], preferred_element_type=jnp.float32
    )                                                                 # (TB, C_pad)


def _choose_groups_per_step(B):
    """Groups per grid step (TB).

    TB must divide B and be a multiple of 8 so the (TB, C_pad) output block is
    sublane-aligned.  Prefer >= 2 grid steps (keeps both v7x TensorCores busy);
    fall back to one full-size step (full-array blocks are always legal).
    """
    if B % 16 == 0:
        return B // 2
    tb = (B // 2) // 8 * 8
    while tb >= 8:
        if B % tb == 0:
            return tb
        tb -= 8
    return B


def classifier_forward(x, y, W1, W2, Lw, J):
    # `y` / `W2` are part of the module's forward signature but -- by the
    # original module's own construction (both concat halves come from
    # `local_features`) -- can never affect the logits.  No DMA, no dead matmul.
    del y, W2

    L, D1 = x.shape
    E = W1.shape[0]
    C = Lw.shape[0]
    assert L % J == 0, "L must be a multiple of J (original module would error otherwise)"
    B = L // J
    C_pad = ((C + 127) // 128) * 128          # lane-dense output

    TB = _choose_groups_per_step(B)           # groups per grid step
    R = TB * J                                # x rows per grid step
    num_steps = B // TB

    # Fold the concatenation AND the 1/J mean into the final linear weight;
    # pre-transpose, pad lanes to 128, cast to bf16.
    Lw_eff = (Lw[:, :E] + Lw[:, E:]) * jnp.float32(1.0 / J)           # (C, E)
    LwT = (
        jnp.zeros((E, C_pad), jnp.float32)
        .at[:, :C].set(Lw_eff.T)
        .astype(jnp.bfloat16)
    )                                                                 # (E, C_pad)

    # Block-diagonal 0/1 pooling matrix: pool[g, r] = 1 iff row r belongs to
    # group g within the step (exact in bf16; the scale lives in LwT).
    pool = (
        jnp.arange(R)[None, :] // J == jnp.arange(TB)[:, None]
    ).astype(jnp.bfloat16)                                            # (TB, R)

    # Natural-layout bf16 operands for the first matmul.
    x_bf = x.astype(jnp.bfloat16)             # (L, D1)
    W1T = W1.T.astype(jnp.bfloat16)           # (D1, E)

    out = pl.pallas_call(
        classifier_kernel,
        grid=(num_steps,),
        out_shape=jax.ShapeDtypeStruct((B, C_pad), jnp.float32),
        in_specs=[
            pl.BlockSpec((R, D1), lambda b: (b, 0)),      # streamed x tile
            pl.BlockSpec((D1, E), lambda b: (0, 0)),      # resident weight
            pl.BlockSpec((TB, R), lambda b: (0, 0)),      # resident pooling mat
            pl.BlockSpec((E, C_pad), lambda b: (0, 0)),   # resident weight
        ],
        out_specs=pl.BlockSpec((TB, C_pad), lambda b: (b, 0)),
        compiler_params=pltpu.CompilerParams(
            dimension_semantics=("parallel",),  # steps are independent groups
        ),
    )(x_bf, W1T, pool, LwT)

    return out[:, :C]


def classifier_reference(x, W1, Lw, J):
    # Pure-JAX f32 reference of the PyTorch forward (y/W2 cannot affect it).
    lf = jnp.maximum(x @ W1.T, 0.0)
    B = x.shape[0] // J
    pooled = jnp.mean(lf.reshape(B, J, -1), axis=1)
    feats = jnp.concatenate([pooled, pooled], axis=1)
    return feats @ Lw.T


if __name__ == "__main__":
    key = jax.random.PRNGKey(0)

    # --- Test 1: J multiple of 8, B=16 -> 2 grid steps of 8 groups each. ---
    J1, B1 = 8, 16
    L1, D1, D2, E, C = B1 * J1, 16, 16, 32, 8
    kx, ky, kw1, kw2, klw, key = jax.random.split(key, 6)
    x1 = jax.random.normal(kx, (L1, D1), dtype=jnp.float32)
    y1 = jax.random.normal(ky, (L1, D2), dtype=jnp.float32)
    W1 = jax.random.normal(kw1, (E, D1), dtype=jnp.float32) * 0.1
    W2 = jax.random.normal(kw2, (E, D2), dtype=jnp.float32) * 0.1
    Lw = jax.random.normal(klw, (C, 2 * E), dtype=jnp.float32) * 0.1

    out1 = jax.block_until_ready(classifier_forward(x1, y1, W1, W2, Lw, J1))
    ref1 = classifier_reference(x1, W1, Lw, J1)
    assert out1.shape == (B1, C)
    assert jnp.allclose(out1, ref1, atol=2e-2, rtol=2e-2), (
        f"test1 max abs err = {jnp.max(jnp.abs(out1 - ref1))}"
    )

    # --- Test 2: original-style J=30 (not a multiple of 8), single grid step. ---
    J2, B2 = 30, 8
    L2 = B2 * J2
    kx2, ky2, key = jax.random.split(key, 3)
    x2 = jax.random.normal(kx2, (L2, D1), dtype=jnp.float32)
    y2 = jax.random.normal(ky2, (L2, D2), dtype=jnp.float32)

    out2 = jax.block_until_ready(classifier_forward(x2, y2, W1, W2, Lw, J2))
    ref2 = classifier_reference(x2, W1, Lw, J2)
    assert out2.shape == (B2, C)
    assert jnp.allclose(out2, ref2, atol=2e-2, rtol=2e-2), (
        f"test2 max abs err = {jnp.max(jnp.abs(out2 - ref2))}"
    )

    print("KERNEL_OK")
</pallas_src>

<mosaic_0001>
module attributes {stable_mosaic.version = 11 : i64} {
  func.func @classifier_kernel(%arg0: i32, %arg1: memref<64x16xbf16, #tpu.memory_space<vmem>>, %arg2: memref<16x32xbf16, #tpu.memory_space<vmem>>, %arg3: memref<8x64xbf16, #tpu.memory_space<vmem>>, %arg4: memref<32x128xbf16, #tpu.memory_space<vmem>>, %arg5: memref<8x128xf32, #tpu.memory_space<vmem>>) attributes {dimension_semantics = [#tpu.dimension_semantics<parallel>], iteration_bounds = array<i64: 2>, scalar_prefetch = 0 : i64, scratch_operands = 0 : i64, tpu.core_type = #tpu.core_type<tc>, window_params = [{transform_indices = @transform_0, window_bounds = array<i64: 64, 16>}, {pipeline_mode = #tpu.pipeline_mode<synchronous>, transform_indices = @transform_1, window_bounds = array<i64: 16, 32>}, {pipeline_mode = #tpu.pipeline_mode<synchronous>, transform_indices = @transform_2, window_bounds = array<i64: 8, 64>}, {pipeline_mode = #tpu.pipeline_mode<synchronous>, transform_indices = @transform_3, window_bounds = array<i64: 32, 128>}, {transform_indices = @transform_4, window_bounds = array<i64: 8, 128>}]} {
    %c0 = arith.constant 0 : index
    %c0_0 = arith.constant 0 : index
    %0 = vector.load %arg1[%c0, %c0_0] : memref<64x16xbf16, #tpu.memory_space<vmem>>, vector<64x16xbf16>
    %c0_1 = arith.constant 0 : index
    %c0_2 = arith.constant 0 : index
    %1 = vector.load %arg2[%c0_1, %c0_2] : memref<16x32xbf16, #tpu.memory_space<vmem>>, vector<16x32xbf16>
    %cst = arith.constant dense<0.000000e+00> : vector<64x32xf32>
    %2 = tpu.matmul %0, %1, %cst {dimension_numbers = #tpu.dot_dimension_numbers<[1], [0], [0], [1], [0, 0, 1, 1], [], []>} : vector<64x16xbf16>, vector<16x32xbf16>, vector<64x32xf32> -> vector<64x32xf32>
    %cst_3 = arith.constant 0.000000e+00 : f32
    %3 = vector.broadcast %cst_3 : f32 to vector<64x32xf32>
    %4 = arith.maximumf %2, %3 : vector<64x32xf32>
    %5 = arith.truncf %4 : vector<64x32xf32> to vector<64x32xbf16>
    %c0_4 = arith.constant 0 : index
    %c0_5 = arith.constant 0 : index
    %6 = vector.load %arg3[%c0_4, %c0_5] : memref<8x64xbf16, #tpu.memory_space<vmem>>, vector<8x64xbf16>
    %cst_6 = arith.constant dense<0.000000e+00> : vector<8x32xf32>
    %7 = tpu.matmul %6, %5, %cst_6 {dimension_numbers = #tpu.dot_dimension_numbers<[1], [0], [0], [1], [0, 0, 1, 1], [], []>} : vector<8x64xbf16>, vector<64x32xbf16>, vector<8x32xf32> -> vector<8x32xf32>
    %8 = arith.truncf %7 : vector<8x32xf32> to vector<8x32xbf16>
    %c0_7 = arith.constant 0 : index
    %c0_8 = arith.constant 0 : index
    %9 = vector.load %arg4[%c0_7, %c0_8] : memref<32x128xbf16, #tpu.memory_space<vmem>>, vector<32x128xbf16>
    %cst_9 = arith.constant dense<0.000000e+00> : vector<8x128xf32>
    %10 = tpu.matmul %8, %9, %cst_9 {dimension_numbers = #tpu.dot_dimension_numbers<[1], [0], [0], [1], [0, 0, 1, 1], [], []>} : vector<8x32xbf16>, vector<32x128xbf16>, vector<8x128xf32> -> vector<8x128xf32>
    %c0_10 = arith.constant 0 : index
    %c0_11 = arith.constant 0 : index
    %11 = vector.load %arg5[%c0_10, %c0_11] : memref<8x128xf32, #tpu.memory_space<vmem>>, vector<8x128xf32>
    tpu.vector_store %arg5[%c0_10, %c0_11], %10 {strides = array<i32>} : memref<8x128xf32, #tpu.memory_space<vmem>>, vector<8x128xf32>,
    return
  }
  func.func @transform_0(%arg0: i32) -> (i32, i32) {
    %c0_i32 = arith.constant 0 : i32
    %c0_i32_0 = arith.constant 0 : i32
    return %arg0, %c0_i32 : i32, i32
  }
  func.func @transform_1(%arg0: i32) -> (i32, i32) {
    %c0_i32 = arith.constant 0 : i32
    %c0_i32_0 = arith.constant 0 : i32
    %c0_i32_1 = arith.constant 0 : i32
    return %c0_i32, %c0_i32_0 : i32, i32
  }
  func.func @transform_2(%arg0: i32) -> (i32, i32) {
    %c0_i32 = arith.constant 0 : i32
    %c0_i32_0 = arith.constant 0 : i32
    %c0_i32_1 = arith.constant 0 : i32
    return %c0_i32, %c0_i32_0 : i32, i32
  }
  func.func @transform_3(%arg0: i32) -> (i32, i32) {
    %c0_i32 = arith.constant 0 : i32
    %c0_i32_0 = arith.constant 0 : i32
    %c0_i32_1 = arith.constant 0 : i32
    return %c0_i32, %c0_i32_0 : i32, i32
  }
  func.func @transform_4(%arg0: i32) -> (i32, i32) {
    %c0_i32 = arith.constant 0 : i32
    %c0_i32_0 = arith.constant 0 : i32
    return %arg0, %c0_i32 : i32, i32
  }
}

</mosaic_0001>

<bundles_post_ra>
// kernel: tpu_custom_call.1
= control target key start
LH: loop header
LB: loop body
LE: loop exit
PB: predicated region body
PF: predicated region fallthrough
CT: control target
= control target key end

     0   :  { %9 = vsyncpa [#allocation3], 0  ;;  %s823_s0 = inlined_call_operand.vmem [shape: bf16[128,16], index: 0, kind: input, shape index: {}]   ;;  %s824_s1 = inlined_call_operand.vmem [shape: bf16[16,32], index: 1, kind: input, shape index: {}]   ;;  %s825_s2 = inlined_call_operand.vmem [shape: bf16[8,64], index: 2, kind: input, shape index: {}]   ;;  %s826_s3 = inlined_call_operand.vmem [shape: bf16[32,128], index: 3, kind: input, shape index: {}]   ;;  %s827_s4 = inlined_call_operand.hbm [shape: f32[16,128], index: 4, kind: output, shape index: {}]  }
   0x1   :  { %11 = vsyncpa [#allocation3 + $0x1], 0  ;;  %s712_s15 = smov 0   ;;  %s714_s16 = smov 0  }
   0x2   :  { %s716_s17 = smov 0   ;;  %s718_s18 = smov 0  }
   0x3 LB: > { %s733_s19 = sadd.s32 4294967295, %s682_s18   ;;  %s505_s20 = sadd.s32 4294967294, %s682_s18   ;;  %s682_s18 = sphi %s718_s18, %s833_s18   ;;  %s678_s17 = sphi %s716_s17, %s832_s17   ;;  %s674_s16 = sphi %s714_s16, %s831_s16   ;;  %s670_s15 = sphi %s712_s15, %s830_s15  }
   0x4   : > { %s737_s21 = sadd.s32 1, %s682_s18   ;;  %s113_s22 = sadd.s32 1, %s678_s17 }
   0x5   : > { %s110_s23 = ssub.s32 %s682_s18, %s737_s21  ;;  %p123_p0 = scmp.ne.s32.totalorder %s678_s17, %s674_s16 }
   0x6   : > { %p111_p1 = scmp.eq.s32.totalorder %s110_s23, 0  ;;  %p124_p2 = scmp.eq.s32.totalorder %s733_s19, 1 }
   0x7   : > { %p129_p3 = scmp.ne.s32.totalorder %s674_s16, %s670_s15  ;;  %p130_p4 = scmp.eq.s32.totalorder %s505_s20, 1 }
   0x8   : > { %s748_s24 = scalar_select %p111_p1, %s678_s17, %s113_s22  }
   0x9   : > { %p750_p5 = por %p124_p2, %p123_p0  ;;  %p754_p6 = por %p130_p4, %p129_p3 }
   0xa   : > { %p508_p7 = scmp.ge.s32.totalorder %s682_s18, 1  ;;  %p166_p8 = scmp.lt.s32.totalorder %s682_s18, 3 }
   0xc   : > { %p167_p9 = pnand %p508_p7, %p166_p8 }
   0xd   : > { %v613_v0 = vld [vmem:[%s824_s1] sm:$0xff] (!%p167_p9)   ;;  %s510_s29 = sshll.u32 (!%p167_p9), %s733_s19, 3  ;;  %vm235_vm0 = vcmask (!%p167_p9), 130048   ;;  %v684_v5 = vmov (!%p167_p9), 0.0   ;;  %vm685_vm1 = vmmov (!%p167_p9), 0   ;;  %v619_v7 = vld [vmem:[%s826_s3 + $0x8] sm:$0xff] (!%p167_p9)  }
   0xe   : > { %170 = sbr.rel (%p167_p9) target bundleno = 701 (0x2bd), region = 36  ;;  %p193_p10 = scmp.lt.s32.totalorder (!%p167_p9), %s510_s29, 15  ;;  %542 = vmatprep.subr.bf16.mxu0 (!%p167_p9), %v613_v0  ;;  %552 = vmatprep.subr.bf16.mxu1 (!%p167_p9), %v684_v5  ;;  %v618_v6 = vld [vmem:[%s826_s3] sm:$0xff] (!%p167_p9)   ;;  %vm326_vm2 = vcmask (!%p167_p9), 523264   ;;  %vm387_vm3 = vcmask (!%p167_p9), 261120  }
   0xf   : > { %543 = vmatpush3.bf16.msra.mxu0 (!%p167_p9), %v613_v0  ;;  %560 = vmatprep.mubr.msk.bf16.mxu1 (!%p167_p9), %vm685_vm1, %v684_v5  ;;  %v325_v28 = vld [vmem:[%s825_s2] sm:$0xf] (!%p167_p9)  ;;  %s189_s14 = sand.u32 (!%p167_p9), 1, %s674_s16   ;;  %s526_s27 = sshll.u32 (!%p167_p9), %s733_s19, 7 }
  0x10   : > { %564 = vmatprep.subr.bf16.mxu0 (!%p167_p9), %v684_v5  ;;  %s509_s20 = sshll.u32 (!%p167_p9), %s189_s14, 3  ;;  %s433_s5 = scalar_lea.sflag (!%p167_p9), [#allocation3], %s189_s14 }
  0x11   : > { %s191_s22 = scalar_lea.vmem (!%p167_p9), [#allocation2], %s509_s20  ;;  %s686_s19 = smov (!%p167_p9), [#allocation2]  }
  0x12   : > { %s446_s23 = sshll.u32 (!%p167_p9), %s191_s22, 4  ;;  %s778_s23 = int_to_ptr.vmem [resolvable:$true] %s446_s23 }
  0x13   : > { %s620_s6 = scalar_lea.vmem (!%p167_p9), %s778_s23, 128 }
  0x14   : > { %p621_p11 = scmp.ne.s32.totalorder (!%p167_p9), %s778_s23, %s620_s6 }
  0x15   : > { %s835_s29 = smov (!%p193_p10, %s510_s29), 15 }
  0x16   : > { %s511_s30 = sshll.u32 %s835_s29, 2  ;;  %p622_p12 = pnand %p621_p11, %p750_p5 }
  0x17   : > { %s196_s7 = scalar_lea.vmem %s823_s0, %s511_s30  ;;  %s783_s30 = scalar_lea.hbm %s827_s4, %s526_s27 }
  0x18   : > { %v614_v1 = vld [vmem:[%s196_s7] sm:$0xff]   ;;  %v615_v2 = vld [vmem:[%s196_s7 + $0x8] sm:$0xff]   ;;  %v616_v3 = vld [vmem:[%s196_s7 + $0x10] sm:$0xff]   ;;  %p623_p13 = pneg %p622_p12 }
  0x19   : > { %544 = vmatprep.mubr.msk.bf16.mxu0 %vm235_vm0, %v614_v1  ;;  %v617_v4 = vld [vmem:[%s196_s7 + $0x18] sm:$0xff]   ;;  %s624_s7 = sshll.u32 %s686_s19, 4  ;;  %s625_s7 = int_to_ptr.vmem [resolvable:$false] %s624_s7 }
  0x1a   : > { %545 = vmatmul.mubr.msk.bf16.vlgmr.msra.gmra.mrb[0].mxu0 %vm235_vm0, %v615_v2  ;;  %s626_s8 = scalar_lea.vmem %s625_s7, 256  ;;  %p627_p0 = scmp.lt.s32.totalorder %s778_s23, %s625_s7 }
  0x1b   : > { %548 = vmatprep.mubr.msk.bf16.mxu0 %vm235_vm0, %v616_v3  ;;  %565 = vmatpush3.bf16.msra.mxu0 %v618_v6  ;;  %p628_p1 = scmp.lt.s32.totalorder %s626_s8, %s620_s6 }
  0x1c   : > { %566 = vmatprep.subr.bf16.mxu0 %v684_v5 }
  0x1d   : > { %p629_p2 = por %p628_p1, %p627_p0 }
  0x1f   : > { %567 = vmatpush3.bf16.msra.mxu0 %v619_v7  ;;  %p630_p3 = pnand %p629_p2, %p623_p13 }
  0x22   : > { %549 = vmatmul.mubr.msk.bf16.gmra.mrb[4].mxu0 %vm235_vm0, %v617_v4 }
  0x23   : > { %568 = vmatprep.mubr.msk.bf16.mxu0 %vm685_vm1, %v684_v5 }
  0xed   : > { %v546_v8 = vpop.f32.mrb[0].mxu0 }
  0xee   : > { %v282_v9 = vpop.f32.mrb[1].mxu0  ;;  %v315_v11 = vmax.f32 %v546_v8, 0.0 }
  0xef   : > { %v547_v10 = vpop.f32.mrb[2].mxu0  ;;  %v313_v14 = vmax.f32 %v282_v9, 0.0 }
  0xf0   : > { %v316_v12 = vmax.f32 %v547_v10, 0.0  ;;  %v285_v13 = vpop.f32.mrb[3].mxu0 }
  0xf1   : > { %v314_v15 = vmax.f32 %v285_v13, 0.0 }
  0xf2   : > { %v322_v16 = vpack.c.bf16 %v316_v12, %v315_v11 }
  0xf3   : > { %v321_v17 = vpack.c.bf16 %v314_v15, %v313_v14 }
  0xf5   : > { %v550_v18 = vpop.f32.mrb[4].mxu0  ;;  %553 = vmatpush3.bf16.msra.mxu1 %v321_v17 }
  0xf6   : > { %v298_v19 = vpop.f32.mrb[5].mxu0  ;;  %554 = vmatprep.subr.bf16.mxu1 %v684_v5  ;;  %v319_v21 = vmax.f32 %v550_v18, 0.0 }
  0xf7   : > { %v551_v20 = vpop.f32.mrb[6].mxu0  ;;  %v317_v24 = vmax.f32 %v298_v19, 0.0 }
  0xf8   : > { %v320_v22 = vmax.f32 %v551_v20, 0.0  ;;  %v301_v23 = vpop.f32.mrb[7].mxu0 }
  0xf9   : > { %v318_v25 = vmax.f32 %v301_v23, 0.0  ;;  %555 = vmatpush3.bf16.msra.mxu1 %v322_v16 }
  0xfa   : > { %v324_v26 = vpack.c.bf16 %v320_v22, %v319_v21  ;;  %556 = vmatprep.subr.bf16.mxu1 %v684_v5 }
  0xfb   : > { %v323_v27 = vpack.c.bf16 %v318_v25, %v317_v24 }
  0xfd   : > { %557 = vmatpush3.bf16.msra.mxu1 %v323_v27 }
  0xfe   : > { %558 = vmatprep.subr.bf16.mxu1 %v684_v5 }
 0x101   : > { %559 = vmatpush3.bf16.msra.mxu1 %v324_v26 }
 0x104   : > { %561 = vmatmul.mubr.msk.bf16.vlgmr.msra.gmra.mrb[0].mxu1 %vm326_vm2, %v325_v28 }
 0x1d7   : > { %v364_v29 = vpop.f32.mrb[0].mxu1 }
 0x1d8   : > { %v370_v30 = vpack.c.bf16 %v364_v29, %v364_v29  ;;  %v562_v31 = vpop.f32.mrb[1].mxu1 }
 0x1d9   : > { %v367_v32 = vpop.f32.mrb[2].mxu1 }
 0x1da   : > { %v563_v33 = vpop.f32.mrb[3].mxu1  ;;  %569 = vmatmul.mubr.msk.bf16.vlgmr.msra.gmra.mrb[8].mxu0 %vm387_vm3, %v370_v30 }
 0x2ad   : > { %v425_v34 = vpop.f32.mrb[8].mxu0 }
 0x2ae   : > { %431 = vst [vmem:[%s191_s22] sm:$0xff] %v425_v34  ;;  %v570_v35 = vpop.f32.mrb[9].mxu0 }
 0x2af   : > { %v428_v36 = vpop.f32.mrb[10].mxu0 }
 0x2b0   : > { %633 = shalt.err (!%p630_p3)
}
 0x2b1   : > { %s634_s9 = scalar_lea.hbm %s783_s30, 128  ;;  %s638_s12 = scalar_lea.hbm %s827_s4, 256 }
 0x2b2   : > { %p635_p4 = scmp.ne.s32.totalorder %s783_s30, %s634_s9  ;;  %p639_p9 = scmp.lt.u32.totalorder %s783_s30, %s827_s4 }
 0x2b3   : > { %p640_p10 = scmp.lt.u32.totalorder %s638_s12, %s634_s9  ;;  %p642_p12 = scmp.lt.u32.totalorder %s634_s9, %s783_s30 }
 0x2b4   : > { %p636_p7 = pnand %p635_p4, %p750_p5 }
 0x2b5   : > { %p641_p11 = por %p640_p10, %p639_p9 }
 0x2b6   : > { %p637_p8 = pneg %p636_p7 }
 0x2b7   : > { %p643_p13 = por %p642_p12, %p641_p11 }
 0x2b9   : > { %p644_p0 = pnand %p643_p13, %p637_p8 }
 0x2bb   : > { %647 = shalt.err (!%p644_p0)
}
 0x2bc   : > { %572 = dma.vmem_to_hbm [thread:$0]  (%p750_p5), %s778_s23, 128, %s783_s30, %s433_s5   ;;  %v571_v37 = vpop.f32.mrb[11].mxu0 }
 0x2bd PF: > { %p578_p1 = scmp.ge.s32.totalorder %s682_s18, 2  ;;  %s458_s20 = sand.u32 1, %s670_s15  }
 0x2be   : > { %s459_s22 = scalar_lea.sflag [#allocation3], %s458_s20 }
 0x2bf   : > { %p575_p2 = pnand %p578_p1, %p754_p6 }
 0x2c1   : > { %665 = dma.done.wait (!%p575_p2), %s459_s22, 128  }
 0x2c2   : > { %667 = vsyncadd (!%p575_p2), %s459_s22, 4294967168  ;;  %p14_p3 = scmp.ge.s32.totalorder %s737_s21, 4   ;;  %s830_s15 = smov %s674_s16 }
 0x2c3   : > { %s831_s16 = smov %s678_s17  ;;  %s832_s17 = smov %s748_s24 }
 0x2c4   : > { %s833_s18 = smov %s737_s21  ;;  %16 = sbr.rel (!%p14_p3) target bundleno = 3 (0x3), region = 71 }
 0x2cb   :  { %464 = vsyncpa [#allocation3], 1 }
 0x2cc   :  { %466 = vsyncpa [#allocation3 + $0x1], 1 }

</bundles_post_ra>
